<compile_context>
chip_gen: v7x
topology: tpu7x:2x2x1
jax: 0.10.0
libtpu: 0.0.40
codegen_flags: <defaults>
</compile_context>

<pallas_src>
import math
import jax
import jax.numpy as jnp
from jax.experimental import pallas as pl
from jax.experimental.pallas import tpu as pltpu

MARGIN = 0.2
_LANE = 128


# ---------------------------------------------------------------------------
# Kernels: apply precomputed channel-merge weights (one batch element per step).
# ---------------------------------------------------------------------------
def _merge_kernel_tc(w_ref, eeg_ref, out_ref):
    # w_ref: (1, C, chout), eeg_ref: (1, Tt, C), out_ref: (1, Tt, chout)
    out_ref[0] = jnp.dot(
        eeg_ref[0], w_ref[0], preferred_element_type=jnp.float32
    ).astype(out_ref.dtype)


def _merge_kernel_ct(w_ref, eeg_ref, out_ref):
    # w_ref: (1, chout, C), eeg_ref: (1, C, Tt), out_ref: (1, chout, Tt)
    out_ref[0] = jnp.dot(
        w_ref[0], eeg_ref[0], preferred_element_type=jnp.float32
    ).astype(out_ref.dtype)


# ---------------------------------------------------------------------------
# Tiling helpers.
# ---------------------------------------------------------------------------
def _cdiv(a, b):
    return (a + b - 1) // b


def _round_up(x, m):
    return ((x + m - 1) // m) * m


def _pick_time_tile(B, T, *, cap, min_steps=4, min_tile=512):
    """Pick a time tile Tt: either Tt == T (full dim) or a multiple of 128, <= cap.
    Shrinks the tile (down to `min_tile`) to keep >= `min_steps` total grid steps so
    both v7x TensorCores get work; never collapses long T into one unbounded block."""
    Tt = min(T, cap)
    while B * _cdiv(T, Tt) < min_steps and Tt > min_tile:
        Tt = max(min_tile, _round_up(Tt // 2, _LANE))
    if Tt != T and Tt % _LANE != 0:
        Tt = _round_up(Tt, _LANE)
        if Tt >= T:
            Tt = T
    return Tt


def _cost_estimate(B, C, T, chout, eeg_itemsize, w_itemsize):
    return pl.CostEstimate(
        flops=2 * B * chout * C * T,
        transcendentals=0,
        bytes_accessed=(B * C * T + B * chout * T) * eeg_itemsize
        + B * chout * C * w_itemsize,
    )


# ---------------------------------------------------------------------------
# Apply paths.
# ---------------------------------------------------------------------------
def channel_merger_apply_tc(eeg_tc, weights_t, *, time_tile_cap=4096):
    """Time-first (module-contract) path, no wrapper permutes.
    eeg_tc: (B, T, C), weights_t: (B, C, chout) -> (B, T, chout)."""
    B, T, C = eeg_tc.shape
    _, _, chout = weights_t.shape
    weights_t = weights_t.astype(eeg_tc.dtype)  # keep MXU on native path (bf16 inputs)
    Tt = _pick_time_tile(B, T, cap=time_tile_cap)
    grid = (B, _cdiv(T, Tt))
    return pl.pallas_call(
        _merge_kernel_tc,
        out_shape=jax.ShapeDtypeStruct((B, T, chout), eeg_tc.dtype),
        grid=grid,
        in_specs=[
            # weights: resident per batch element across all time tiles
            pl.BlockSpec((1, C, chout), lambda b, t: (b, 0, 0)),
            pl.BlockSpec((1, Tt, C), lambda b, t: (b, t, 0)),
        ],
        out_specs=pl.BlockSpec((1, Tt, chout), lambda b, t: (b, t, 0)),
        compiler_params=pltpu.CompilerParams(
            dimension_semantics=("parallel", "parallel")
        ),
        cost_estimate=_cost_estimate(
            B, C, T, chout, eeg_tc.dtype.itemsize, weights_t.dtype.itemsize
        ),
    )(weights_t, eeg_tc)


def channel_merger_apply_ct(eeg_ct, weights, *, time_tile_cap=32768):
    """Channels-first lane-dense path (time on the 128-lane axis).
    eeg_ct: (B, C, T), weights: (B, chout, C) -> (B, chout, T)."""
    B, C, T = eeg_ct.shape
    _, chout, _ = weights.shape
    weights = weights.astype(eeg_ct.dtype)
    Tt = _pick_time_tile(B, T, cap=time_tile_cap)
    grid = (B, _cdiv(T, Tt))
    return pl.pallas_call(
        _merge_kernel_ct,
        out_shape=jax.ShapeDtypeStruct((B, chout, T), eeg_ct.dtype),
        grid=grid,
        in_specs=[
            pl.BlockSpec((1, chout, C), lambda b, t: (b, 0, 0)),
            pl.BlockSpec((1, C, Tt), lambda b, t: (b, 0, t)),
        ],
        out_specs=pl.BlockSpec((1, chout, Tt), lambda b, t: (b, 0, t)),
        compiler_params=pltpu.CompilerParams(
            dimension_semantics=("parallel", "parallel")
        ),
        cost_estimate=_cost_estimate(
            B, C, T, chout, eeg_ct.dtype.itemsize, weights.dtype.itemsize
        ),
    )(weights, eeg_ct)


# ---------------------------------------------------------------------------
# Wrapper-side (tiny, T-independent) weight computation: Fourier embedding of
# sensor positions, per-head scores, softmax over channels.
# ---------------------------------------------------------------------------
def compute_merge_weights(positions, heads, *, pos_dim, margin=MARGIN):
    """positions: (B, C, 2), heads: (chout, pos_dim) -> weights (B, chout, C)."""
    half = pos_dim // 2
    n_freqs = int(round(half ** 0.5))
    assert n_freqs * n_freqs * 2 == pos_dim

    width = 1.0 + 2.0 * margin
    base = 2.0 * math.pi * jnp.arange(n_freqs, dtype=jnp.float32) / width
    # flattened (i, j) grid, row-major: matches torch's .view(*O, -1) of (nf_x, nf_y)
    fx = jnp.repeat(base, n_freqs)          # coefficient of x -> freq i
    fy = jnp.tile(base, n_freqs)            # coefficient of y -> freq j
    F = jnp.stack([fx, fy], axis=0)         # (2, half)

    loc = (positions.astype(jnp.float32) + margin) @ F               # (B, C, half)
    emb = jnp.concatenate([jnp.cos(loc), jnp.sin(loc)], axis=-1)     # (B, C, pos_dim)
    scores = jnp.einsum('bcd,od->boc', emb, heads.astype(jnp.float32))  # (B, chout, C)
    return jax.nn.softmax(scores, axis=2)                            # softmax over channels


def channel_merger_pallas(eeg, positions, sub, heads, *, pos_dim, margin=MARGIN,
                          time_tile_cap=4096):
    """Matches module forward: eeg (B, T, C), positions (B, C, 2), heads (chout, pos_dim)
    -> (B, T, chout).  `sub` is unused (per_subject=False).  No large HBM permutes:
    the kernel consumes the (B, T, C) layout directly."""
    del sub  # per_subject=False -> subject gather is a no-op
    B, T, C = eeg.shape
    chout, pd = heads.shape
    assert pd == pos_dim and pos_dim % 4 == 0

    # TODO(synk): training-time dropout "ban" mask, usage_penalty accumulation and
    # per_subject head gather are not implemented (eval mode, per_subject=False).
    weights = compute_merge_weights(positions, heads, pos_dim=pos_dim, margin=margin)
    weights_t = jnp.transpose(weights, (0, 2, 1))   # (B, C, chout): tiny, negligible
    return channel_merger_apply_tc(eeg, weights_t, time_tile_cap=time_tile_cap)


# ---------------------------------------------------------------------------
# Pure-JAX reference mirroring the PyTorch forward (eval, per_subject=False).
# ---------------------------------------------------------------------------
def channel_merger_reference(eeg, positions, heads, *, pos_dim, margin=MARGIN):
    B, T, C = eeg.shape
    n_freqs = int(round((pos_dim // 2) ** 0.5))
    width = 1.0 + 2.0 * margin
    freqs = jnp.arange(n_freqs, dtype=jnp.float32)
    p = positions + margin
    p_x = 2.0 * jnp.pi * freqs[:, None] / width        # (nf, 1)
    p_y = 2.0 * jnp.pi * freqs / width                 # (nf,)
    loc = (p[..., None, None, 0] * p_x + p[..., None, None, 1] * p_y).reshape(B, C, -1)
    emb = jnp.concatenate([jnp.cos(loc), jnp.sin(loc)], axis=-1)    # (B, C, pos_dim)
    scores = jnp.einsum('bcd,od->boc', emb, heads)                  # (B, chout, C)
    weights = jax.nn.softmax(scores, axis=2)
    eeg_p = jnp.transpose(eeg, (0, 2, 1))                           # (B, C, T)
    out = jnp.einsum('bct,boc->bot', eeg_p, weights)                # (B, chout, T)
    return jnp.transpose(out, (0, 2, 1))                            # (B, T, chout)


if __name__ == "__main__":
    # Small shapes consistent with the module: pos_dim must be 2*k^2 and %4==0 -> 32.
    B, T, C = 2, 64, 16
    chout, pos_dim = 8, 32

    key = jax.random.PRNGKey(0)
    k_eeg, k_pos, k_heads, k_eeg2 = jax.random.split(key, 4)
    eeg = jax.random.normal(k_eeg, (B, T, C), dtype=jnp.float32)
    positions = jax.random.uniform(k_pos, (B, C, 2), dtype=jnp.float32)  # in [0, 1]
    sub = jnp.zeros((B,), dtype=jnp.int32)  # unused: per_subject=False
    # nn.Parameter(torch.randn(chout, pos_dim)) / sqrt(pos_dim), deterministic in-script
    heads = jax.random.normal(k_heads, (chout, pos_dim), dtype=jnp.float32) / math.sqrt(pos_dim)

    # 1) Module-contract path (time-first kernel, no wrapper permutes).
    out = channel_merger_pallas(eeg, positions, sub, heads, pos_dim=pos_dim)
    out = jax.block_until_ready(out)
    ref = channel_merger_reference(eeg, positions, heads, pos_dim=pos_dim)
    assert out.shape == (B, T, chout)
    assert jnp.allclose(out, ref, rtol=2e-3, atol=2e-3), \
        f"tc path: max abs err {jnp.max(jnp.abs(out - ref))}"

    # 2) Channels-first lane-dense path (for callers already holding (B, C, T)).
    weights = compute_merge_weights(positions, heads, pos_dim=pos_dim)
    out_ct = channel_merger_apply_ct(jnp.transpose(eeg, (0, 2, 1)), weights)
    out_ct = jax.block_until_ready(out_ct)
    assert jnp.allclose(jnp.transpose(out_ct, (0, 2, 1)), ref, rtol=2e-3, atol=2e-3), \
        f"ct path: max abs err {jnp.max(jnp.abs(jnp.transpose(out_ct, (0, 2, 1)) - ref))}"

    # 3) Multi-tile / partial-last-tile path: T not a multiple of 128 with several
    #    grid steps (exercises the masked-boundary handling flagged in review).
    T2 = 320
    eeg2 = jax.random.normal(k_eeg2, (B, T2, C), dtype=jnp.float32)
    out2 = channel_merger_pallas(eeg2, positions, sub, heads, pos_dim=pos_dim,
                                 time_tile_cap=128)
    out2 = jax.block_until_ready(out2)
    ref2 = channel_merger_reference(eeg2, positions, heads, pos_dim=pos_dim)
    assert jnp.allclose(out2, ref2, rtol=2e-3, atol=2e-3), \
        f"tiled path: max abs err {jnp.max(jnp.abs(out2 - ref2))}"

    print("KERNEL_OK")
</pallas_src>

<mosaic_0001>
module attributes {stable_mosaic.version = 11 : i64} {
  func.func @_merge_kernel_tc(%arg0: i32, %arg1: i32, %arg2: memref<1x16x8xf32, #tpu.memory_space<vmem>>, %arg3: memref<1x64x16xf32, #tpu.memory_space<vmem>>, %arg4: memref<1x64x8xf32, #tpu.memory_space<vmem>>) attributes {dimension_semantics = [#tpu.dimension_semantics<parallel>, #tpu.dimension_semantics<parallel>], iteration_bounds = array<i64: 2, 1>, scalar_prefetch = 0 : i64, scratch_operands = 0 : i64, tpu.core_type = #tpu.core_type<tc>, window_params = [{transform_indices = @transform_0, window_bounds = array<i64: 1, 16, 8>}, {transform_indices = @transform_1, window_bounds = array<i64: 1, 64, 16>}, {transform_indices = @transform_2, window_bounds = array<i64: 1, 64, 8>}]} {
    %c0 = arith.constant 0 : index
    %c0_0 = arith.constant 0 : index
    %c0_1 = arith.constant 0 : index
    %0 = vector.load %arg3[%c0, %c0_0, %c0_1] : memref<1x64x16xf32, #tpu.memory_space<vmem>>, vector<1x64x16xf32>
    %1 = vector.shape_cast %0 : vector<1x64x16xf32> to vector<64x16xf32>
    %c0_2 = arith.constant 0 : index
    %c0_3 = arith.constant 0 : index
    %c0_4 = arith.constant 0 : index
    %2 = vector.load %arg2[%c0_2, %c0_3, %c0_4] : memref<1x16x8xf32, #tpu.memory_space<vmem>>, vector<1x16x8xf32>
    %3 = vector.shape_cast %2 : vector<1x16x8xf32> to vector<16x8xf32>
    %cst = arith.constant dense<0.000000e+00> : vector<64x8xf32>
    %4 = tpu.matmul %1, %3, %cst {dimension_numbers = #tpu.dot_dimension_numbers<[1], [0], [0], [1], [0, 0, 1, 1], [], []>} : vector<64x16xf32>, vector<16x8xf32>, vector<64x8xf32> -> vector<64x8xf32>
    %c0_5 = arith.constant 0 : index
    %c0_6 = arith.constant 0 : index
    %c0_7 = arith.constant 0 : index
    %5 = vector.load %arg4[%c0_5, %c0_6, %c0_7] : memref<1x64x8xf32, #tpu.memory_space<vmem>>, vector<1x64x8xf32>
    %6 = vector.shape_cast %5 : vector<1x64x8xf32> to vector<64x8xf32>
    %7 = vector.shape_cast %4 : vector<64x8xf32> to vector<1x64x8xf32>
    tpu.vector_store %arg4[%c0_5, %c0_6, %c0_7], %7 {strides = array<i32>} : memref<1x64x8xf32, #tpu.memory_space<vmem>>, vector<1x64x8xf32>,
    return
  }
  func.func @transform_0(%arg0: i32, %arg1: i32) -> (i32, i32, i32) {
    %c0_i32 = arith.constant 0 : i32
    %c0_i32_0 = arith.constant 0 : i32
    %c0_i32_1 = arith.constant 0 : i32
    return %arg0, %c0_i32, %c0_i32_0 : i32, i32, i32
  }
  func.func @transform_1(%arg0: i32, %arg1: i32) -> (i32, i32, i32) {
    %c0_i32 = arith.constant 0 : i32
    %c0_i32_0 = arith.constant 0 : i32
    return %arg0, %arg1, %c0_i32 : i32, i32, i32
  }
  func.func @transform_2(%arg0: i32, %arg1: i32) -> (i32, i32, i32) {
    %c0_i32 = arith.constant 0 : i32
    %c0_i32_0 = arith.constant 0 : i32
    return %arg0, %arg1, %c0_i32 : i32, i32, i32
  }
}

</mosaic_0001>

<bundles_post_ra>
// kernel: tpu_custom_call.1
= control target key start
LH: loop header
LB: loop body
LE: loop exit
PB: predicated region body
PF: predicated region fallthrough
CT: control target
= control target key end

     0   :  { %s570_s9 = smov 0   ;;  %s572_s10 = smov 0   ;;  %s626_s0 = inlined_call_operand.vmem [shape: f32[2,16,8], index: 0, kind: input, shape index: {}]   ;;  %s627_s1 = inlined_call_operand.vmem [shape: f32[2,64,16], index: 1, kind: input, shape index: {}]   ;;  %s628_s2 = inlined_call_operand.vmem [shape: f32[2,64,8], index: 2, kind: output, shape index: {}]  }
   0x1   :  { %s574_s11 = smov 0  }
   0x2 LB: > { %s24_s12 = sadd.s32 1, %s549_s10  ;;  %p455_p0 = scmp.ge.s32.totalorder %s553_s11, 1  ;;  %s553_s11 = sphi %s574_s11, %s12_s11   ;;  %s549_s10 = sphi %s572_s10, %s630_s10   ;;  %s545_s9 = sphi %s570_s9, %s629_s9  }
   0x3   : > { %p26_p1 = scmp.ge.s32.totalorder %s24_s12, 2  ;;  %p143_p2 = scmp.lt.s32.totalorder %s553_s11, 3 }
   0x5   : > { %s632_s12 = smov (%p26_p1, %s24_s12), 0  ;;  %p144_p3 = pnand %p455_p0, %p143_p2 }
   0x6   : > { %p178_p4 = scmp.lt.s32.totalorder (!%p144_p3), %s545_s9, 1  ;;  %vm213_vm0 = vcmask (!%p144_p3), 130048   ;;  %vm343_vm1 = vcmask (!%p144_p3), 64512  }
   0x7   : > { %147 = sbr.rel (%p144_p3) target bundleno = 243 (0xf3), region = 28 }
   0xe   : > { %s634_s9 = smov (!%p178_p4, %s545_s9), 1 }
   0xf   : > { %s472_s13 = sshll.u32 %s634_s9, 4  ;;  %s473_s14 = sshll.u32 %s634_s9, 6 }
  0x10   : > { %s182_s17 = scalar_lea.vmem %s626_s0, %s472_s13  ;;  %s191_s20 = scalar_lea.vmem %s627_s1, %s473_s14 }
  0x11   : > { %v211_v0 = vld [vmem:[%s182_s17] sm:$0xff]  ;;  %v212_v1 = vld [vmem:[%s182_s17 + $0x8] sm:$0xff]  ;;  %v205_v7 = vld [vmem:[%s191_s20 + $0x10] sm:$0xff]  ;;  %s201_s23 = scalar_lea.vmem %s628_s2, %s473_s14 }
  0x12   : > { %v203_v2 = vld [vmem:[%s191_s20] sm:$0xff]  ;;  %v501_v3 = vpack.c.bf16 %v212_v1, %v211_v0  ;;  %v204_v5 = vld [vmem:[%s191_s20 + $0x8] sm:$0xff]  ;;  %v209_v8 = vld [vmem:[%s191_s20 + $0x30] sm:$0xff] }
  0x13   : > { %489 = vmatprep.mubr.msk.f32.mxu0 %vm213_vm0, %v203_v2  ;;  %v207_v4 = vld [vmem:[%s191_s20 + $0x20] sm:$0xff]  ;;  %v208_v6 = vld [vmem:[%s191_s20 + $0x28] sm:$0xff]  ;;  %v206_v9 = vld [vmem:[%s191_s20 + $0x18] sm:$0xff] }
  0x14   : > { %495 = vmatprep.mubr.msk.f32.mxu1 %vm213_vm0, %v207_v4  ;;  %502 = vmatprep.subr.bf16.mxu0 %v501_v3  ;;  %v210_v10 = vld [vmem:[%s191_s20 + $0x38] sm:$0xff] }
  0x15   : > { %505 = vmatprep.subr.bf16.mxu1 %v501_v3  ;;  %504 = vmatpush3.bf16.msra.mxu0 %v501_v3 }
  0x16   : > { %506 = vmatpush3.bf16.msra.mxu1 %v501_v3 }
  0x18   : > { %490 = vmatmul.mubr.msk.f32.vlgmr.msra.gmra.mrb[0].mxu0 %vm213_vm0, %v204_v5 }
  0x19   : > { %496 = vmatmul.mubr.msk.f32.vlgmr.msra.gmra.mrb[0].mxu1 %vm213_vm0, %v208_v6  ;;  %492 = vmatprep.mubr.msk.f32.mxu0 %vm213_vm0, %v205_v7 }
  0x1a   : > { %498 = vmatprep.mubr.msk.f32.mxu1 %vm213_vm0, %v209_v8 }
  0x1c   : > { %493 = vmatmul.mubr.msk.f32.gmra.mrb[2].mxu0 %vm213_vm0, %v206_v9 }
  0x1d   : > { %499 = vmatmul.mubr.msk.f32.gmra.mrb[2].mxu1 %vm213_vm0, %v210_v10 }
  0xeb   : > { %v491_v11 = vpop.f32.mrb[0].mxu0 }
  0xec   : > { %v497_v12 = vpop.f32.mrb[0].mxu1  ;;  %345 = vst.msk [vmem:[%s201_s23 + $0x8] sm:$0xff] %vm343_vm1, %v491_v11  ;;  %v304_v13 = vpop.f32.mrb[1].mxu0 }
  0xed   : > { %349 = vst.msk [vmem:[%s201_s23 + $0x28] sm:$0xff] %vm343_vm1, %v497_v12  ;;  %v324_v14 = vpop.f32.mrb[1].mxu1  ;;  %344 = vst.msk [vmem:[%s201_s23] sm:$0xff] %vm343_vm1, %v304_v13 }
  0xee   : > { %348 = vst.msk [vmem:[%s201_s23 + $0x20] sm:$0xff] %vm343_vm1, %v324_v14 }
  0xef   : > { %v494_v15 = vpop.f32.mrb[2].mxu0 }
  0xf0   : > { %v500_v16 = vpop.f32.mrb[2].mxu1  ;;  %347 = vst.msk [vmem:[%s201_s23 + $0x18] sm:$0xff] %vm343_vm1, %v494_v15  ;;  %v314_v17 = vpop.f32.mrb[3].mxu0 }
  0xf1   : > { %351 = vst.msk [vmem:[%s201_s23 + $0x38] sm:$0xff] %vm343_vm1, %v500_v16  ;;  %v334_v18 = vpop.f32.mrb[3].mxu1  ;;  %346 = vst.msk [vmem:[%s201_s23 + $0x10] sm:$0xff] %vm343_vm1, %v314_v17 }
  0xf2   : > { %350 = vst.msk [vmem:[%s201_s23 + $0x30] sm:$0xff] %vm343_vm1, %v334_v18 }
  0xf3 PF: > { %s12_s11 = sadd.s32 1, %s553_s11   ;;  %s629_s9 = smov %s549_s10 }
  0xf4   : > { %p9_p5 = scmp.ge.s32.totalorder %s12_s11, 4   ;;  %s630_s10 = smov %s632_s12 }
  0xf6   :  { %11 = sbr.rel (!%p9_p5) target bundleno = 2 (0x2), region = 61 }

</bundles_post_ra>
